<compile_context>
chip_gen: v7x
topology: tpu7x:2x2x1
jax: 0.10.0
libtpu: 0.0.40
codegen_flags: <defaults>
</compile_context>

<pallas_src>
import jax
import jax.numpy as jnp
from jax.experimental import pallas as pl
from jax.experimental.pallas import tpu as pltpu

IN_FEATURES = 1280

# 2048 rows * 1280 feats * 4 B (f32) = 10 MiB per buffer -> 20 MiB double-buffered for x,
# plus ~1.3 MiB for the (1280,1) weight buffers and ~2 MiB for the lane-padded output blocks
# => ~23 MiB, inside the 32 MiB scoped-VMEM limit requested below (v5e/v6e: 128 MiB physical,
# v7x: 64 MiB physical). bf16 activations need half of that.
TILE_B_MAX = 2048
VMEM_LIMIT_BYTES = 32 * 1024 * 1024


def classifier_kernel(x_ref, w_ref, b_ref, o_ref):
    # x_ref: (tile_b, 1280) VMEM tile in x's native dtype,
    # w_ref: (1280, 1) VMEM (grid-resident), b_ref: (1, 1) SMEM scalar, o_ref: (tile_b, 1) f32.
    logits = jnp.dot(x_ref[...], w_ref[...], preferred_element_type=jnp.float32)  # MXU, f32 acc
    logits = logits + b_ref[0, 0]                       # scalar bias from SMEM
    o_ref[...] = jax.nn.sigmoid(logits).astype(o_ref.dtype)


def _round_up(n, m):
    return (n + m - 1) // m * m


def classifier_forward(x, w, b):
    """sigmoid(x.view(B,-1) @ w + b).  w: (1280, 1) (nn.Linear weight transposed), b: (1,).

    x may be f32 or bf16 and is streamed in its native dtype (no wrapper upcast).
    Note: w is cast to x's dtype for the MXU dot (bf16 product precision when x is bf16);
    accumulation stays f32 -- fine for a sigmoid head."""
    B = x.shape[0]
    x2 = x.reshape(B, -1)                               # keep native dtype
    assert x2.shape[1] == IN_FEATURES, f"expected {IN_FEATURES} features, got {x2.shape[1]}"
    w2 = w.reshape(IN_FEATURES, 1).astype(x2.dtype)     # tiny cast, matches x for the MXU
    b2 = jnp.asarray(b, jnp.float32).reshape(1, 1)      # scalar -> SMEM

    # No jnp.pad: the block's sublane dim just has to be a multiple of 8; Pallas masks the
    # partial boundary block (garbage tail rows only affect their own, never-written outputs).
    tile_b = min(TILE_B_MAX, _round_up(B, 8))
    grid = (pl.cdiv(B, tile_b),)

    x_bytes = B * IN_FEATURES * x2.dtype.itemsize
    cost = pl.CostEstimate(
        flops=2 * B * IN_FEATURES,
        transcendentals=B,                                            # one exp per row (EUP)
        bytes_accessed=x_bytes + 4 * B + 4 * IN_FEATURES + 4,         # x + out + w + b
    )

    out = pl.pallas_call(
        classifier_kernel,
        out_shape=jax.ShapeDtypeStruct((B, 1), jnp.float32),
        grid_spec=pltpu.PrefetchScalarGridSpec(
            num_scalar_prefetch=0,
            grid=grid,
            in_specs=[
                pl.BlockSpec((tile_b, IN_FEATURES), lambda i: (i, 0)),   # x: batch-tiled, double-buffered
                pl.BlockSpec((IN_FEATURES, 1), lambda i: (0, 0)),        # w: VMEM-resident (constant index)
                pl.BlockSpec(memory_space=pltpu.MemorySpace.SMEM),       # bias: SMEM scalar
            ],
            out_specs=pl.BlockSpec((tile_b, 1), lambda i: (i, 0)),
        ),
        compiler_params=pltpu.CompilerParams(
            dimension_semantics=("parallel",),   # independent batch tiles -> v7x 2-TC sharding
            vmem_limit_bytes=VMEM_LIMIT_BYTES,   # 2048-row tiles need >16 MiB (v5e default)
        ),
        cost_estimate=cost,
    )(x2, w2, b2)
    return out


if __name__ == "__main__":
    key = jax.random.PRNGKey(0)
    kx, kw, kb, kx2, kx3 = jax.random.split(key, 5)

    # nn.Linear(1280, 1): weight (1, 1280), bias (1,). Stored transposed as (1280, 1).
    bound = 1.0 / (IN_FEATURES ** 0.5)
    w = jax.random.uniform(kw, (IN_FEATURES, 1), jnp.float32, -bound, bound)
    b = jax.random.uniform(kb, (1,), jnp.float32, -bound, bound)

    # NOTE: nn.Dropout(p=0.2) is defined in the module but never applied in forward -> no-op.

    # Case 1: tiny batch (block padded to 8 sublanes, boundary rows masked by Pallas).
    B = 2
    x = jax.random.normal(kx, (B, IN_FEATURES), jnp.float32)
    out = jax.block_until_ready(classifier_forward(x, w, b))
    ref = jax.nn.sigmoid(x @ w + b.reshape(1, 1))
    assert out.shape == (B, 1)
    assert jnp.allclose(out, ref, atol=1e-5, rtol=1e-5)

    # Case 2: ragged batch (not a multiple of 8) -- no jnp.pad, partial boundary block masked.
    B2 = 13
    x_r = jax.random.normal(kx2, (B2, IN_FEATURES), jnp.float32)
    out_r = jax.block_until_ready(classifier_forward(x_r, w, b))
    ref_r = jax.nn.sigmoid(x_r @ w + b.reshape(1, 1))
    assert out_r.shape == (B2, 1)
    assert jnp.allclose(out_r, ref_r, atol=1e-5, rtol=1e-5)

    # Case 3: bf16 activations streamed natively (half the HBM bytes), f32 accumulation.
    B3 = 5
    x_h = jax.random.normal(kx3, (B3, IN_FEATURES), jnp.bfloat16)
    out_h = jax.block_until_ready(classifier_forward(x_h, w, b))
    ref_h = jax.nn.sigmoid(x_h.astype(jnp.float32) @ w + b.reshape(1, 1))
    assert out_h.shape == (B3, 1)
    assert jnp.allclose(out_h, ref_h, atol=2e-2, rtol=2e-2)

    print("KERNEL_OK")
</pallas_src>

<mosaic_0001>
module attributes {stable_mosaic.version = 11 : i64} {
  func.func @classifier_kernel(%arg0: i32, %arg1: memref<8x1280xf32, #tpu.memory_space<vmem>>, %arg2: memref<1280x1xf32, #tpu.memory_space<vmem>>, %arg3: memref<1x1xf32, #tpu.memory_space<smem>>, %arg4: memref<8x1xf32, #tpu.memory_space<vmem>>) attributes {dimension_semantics = [#tpu.dimension_semantics<parallel>], iteration_bounds = array<i64: 1>, scalar_prefetch = 0 : i64, scratch_operands = 0 : i64, tpu.core_type = #tpu.core_type<tc>, window_params = [{transform_indices = @transform_0, window_bounds = array<i64: 8, 1280>}, {pipeline_mode = #tpu.pipeline_mode<synchronous>, transform_indices = @transform_1, window_bounds = array<i64: 1280, 1>}, {transform_indices = @transform_2, window_bounds = array<i64: 1, 1>}, {transform_indices = @transform_3, window_bounds = array<i64: 8, 1>}]} {
    %c0 = arith.constant 0 : index
    %c0_0 = arith.constant 0 : index
    %0 = vector.load %arg1[%c0, %c0_0] : memref<8x1280xf32, #tpu.memory_space<vmem>>, vector<8x1280xf32>
    %c0_1 = arith.constant 0 : index
    %c0_2 = arith.constant 0 : index
    %1 = vector.load %arg2[%c0_1, %c0_2] : memref<1280x1xf32, #tpu.memory_space<vmem>>, vector<1280x1xf32>
    %cst = arith.constant dense<0.000000e+00> : vector<8x1xf32>
    %2 = tpu.matmul %0, %1, %cst {dimension_numbers = #tpu.dot_dimension_numbers<[1], [0], [0], [1], [0, 0, 1, 1], [], []>} : vector<8x1280xf32>, vector<1280x1xf32>, vector<8x1xf32> -> vector<8x1xf32>
    %c0_3 = arith.constant 0 : index
    %c0_4 = arith.constant 0 : index
    %3 = memref.load %arg3[%c0_3, %c0_4] : memref<1x1xf32, #tpu.memory_space<smem>>
    %4 = vector.broadcast %3 : f32 to vector<8x1xf32>
    %5 = arith.addf %2, %4 : vector<8x1xf32>
    %6 = arith.negf %5 : vector<8x1xf32>
    %7 = math.exp %6 : vector<8x1xf32>
    %cst_5 = arith.constant 1.000000e+00 : f32
    %8 = vector.broadcast %cst_5 : f32 to vector<8x1xf32>
    %9 = arith.addf %8, %7 : vector<8x1xf32>
    %10 = arith.divf %8, %9 : vector<8x1xf32>
    %c0_6 = arith.constant 0 : index
    %c0_7 = arith.constant 0 : index
    %11 = vector.load %arg4[%c0_6, %c0_7] : memref<8x1xf32, #tpu.memory_space<vmem>>, vector<8x1xf32>
    tpu.vector_store %arg4[%c0_6, %c0_7], %10 {strides = array<i32>} : memref<8x1xf32, #tpu.memory_space<vmem>>, vector<8x1xf32>,
    return
  }
  func.func @transform_0(%arg0: i32) -> (i32, i32) {
    %c0_i32 = arith.constant 0 : i32
    %c0_i32_0 = arith.constant 0 : i32
    return %arg0, %c0_i32 : i32, i32
  }
  func.func @transform_1(%arg0: i32) -> (i32, i32) {
    %c0_i32 = arith.constant 0 : i32
    %c0_i32_0 = arith.constant 0 : i32
    %c0_i32_1 = arith.constant 0 : i32
    return %c0_i32, %c0_i32_0 : i32, i32
  }
  func.func @transform_2(%arg0: i32) -> (i32, i32) {
    %c0_i32 = arith.constant 0 : i32
    %c0_i32_0 = arith.constant 0 : i32
    %c0_i32_1 = arith.constant 0 : i32
    return %c0_i32, %c0_i32_0 : i32, i32
  }
  func.func @transform_3(%arg0: i32) -> (i32, i32) {
    %c0_i32 = arith.constant 0 : i32
    %c0_i32_0 = arith.constant 0 : i32
    return %arg0, %c0_i32 : i32, i32
  }
}

</mosaic_0001>

<bundles_post_ra>
// kernel: tpu_custom_call.1
= control target key start
LH: loop header
LB: loop body
LE: loop exit
PB: predicated region body
PF: predicated region fallthrough
CT: control target
= control target key end

     0   :  { %v1053_v51 = vmov 1983009808   ;;  %v208_v53 = vlaneseq  ;;  %vm657_vm0 = vcmask 7168   ;;  %s1626_s0 = inlined_call_operand.vmem [shape: f32[2,1280], index: 0, kind: input, shape index: {}]   ;;  %s1627_s1 = inlined_call_operand.vmem [shape: f32[1280,1], index: 1, kind: input, shape index: {}]   ;;  %s1628_s2 = inlined_call_operand.<no memory space> [shape: f32[1,1], index: 2, kind: input, shape index: {}]   ;;  %s1629_s3 = inlined_call_operand.vmem [shape: f32[2,1], index: 3, kind: output, shape index: {}]  }
   0x1   :  { %v43_v0 = vld [vmem:[%s1627_s1 + $0x80] sm:$0xff]  ;;  %v44_v1 = vld [vmem:[%s1627_s1 + $0x88] sm:$0xff]  ;;  %v45_v11 = vld [vmem:[%s1627_s1 + $0x90] sm:$0xff]  ;;  %v206_v52 = vunpack.c.l.s4 %v1053_v51 }
   0x2   :  { %v27_v2 = vld [vmem:[%s1627_s1] sm:$0xff]  ;;  %v874_v3 = vpack.c.bf16 %v44_v1, %v43_v0  ;;  %v28_v4 = vld [vmem:[%s1627_s1 + $0x8] sm:$0xff]  ;;  %v46_v13 = vld [vmem:[%s1627_s1 + $0x98] sm:$0xff] }
   0x3   :  { %v75_v5 = vld [vmem:[%s1627_s1 + $0x180] sm:$0xff]  ;;  %v76_v6 = vld [vmem:[%s1627_s1 + $0x188] sm:$0xff]  ;;  %v876_v7 = vpack.c.bf16 %v28_v4, %v27_v2  ;;  %v29_v14 = vld [vmem:[%s1627_s1 + $0x10] sm:$0xff]  ;;  %v878_v16 = vpack.c.bf16 %v46_v13, %v45_v11  ;;  %v207_v2 = vunpack.c.0.s8 %v206_v52 }
   0x4   :  { %v906_v8 = vpack.c.bf16 %v76_v6, %v75_v5  ;;  %v59_v9 = vld [vmem:[%s1627_s1 + $0x100] sm:$0xff]  ;;  %v60_v10 = vld [vmem:[%s1627_s1 + $0x108] sm:$0xff]  ;;  %875 = vmatprep.subr.bf16.mxu0 %v874_v3  ;;  %v30_v15 = vld [vmem:[%s1627_s1 + $0x18] sm:$0xff]  ;;  %v209_v3 = vshrl.u32 %v208_v53, 7 }
   0x5   :  { %v908_v12 = vpack.c.bf16 %v60_v10, %v59_v9  ;;  %877 = vmatpush3.bf16.msra.mxu0 %v876_v7  ;;  %v880_v17 = vpack.c.bf16 %v30_v15, %v29_v14  ;;  %v77_v18 = vld [vmem:[%s1627_s1 + $0x190] sm:$0xff]  ;;  %v78_v19 = vld [vmem:[%s1627_s1 + $0x198] sm:$0xff]  ;;  %v47_v23 = vld [vmem:[%s1627_s1 + $0xa0] sm:$0xff] }
   0x6   :  { %907 = vmatprep.subr.bf16.mxu1 %v906_v8  ;;  %v61_v20 = vld [vmem:[%s1627_s1 + $0x110] sm:$0xff]  ;;  %v910_v21 = vpack.c.bf16 %v78_v19, %v77_v18  ;;  %v62_v22 = vld [vmem:[%s1627_s1 + $0x118] sm:$0xff]  ;;  %v48_v24 = vld [vmem:[%s1627_s1 + $0xa8] sm:$0xff]  ;;  %879 = vmatprep.subr.bf16.mxu0 %v878_v16 }
   0x7   :  { %909 = vmatpush3.bf16.msra.mxu1 %v908_v12  ;;  %v912_v25 = vpack.c.bf16 %v62_v22, %v61_v20  ;;  %v882_v26 = vpack.c.bf16 %v48_v24, %v47_v23  ;;  %v31_v27 = vld [vmem:[%s1627_s1 + $0x20] sm:$0xff]  ;;  %v32_v28 = vld [vmem:[%s1627_s1 + $0x28] sm:$0xff]  ;;  %v49_v35 = vld [vmem:[%s1627_s1 + $0xb0] sm:$0xff] }
   0x8   :  { %v79_v29 = vld [vmem:[%s1627_s1 + $0x1a0] sm:$0xff]  ;;  %911 = vmatprep.subr.bf16.mxu1 %v910_v21  ;;  %v80_v30 = vld [vmem:[%s1627_s1 + $0x1a8] sm:$0xff]  ;;  %v884_v33 = vpack.c.bf16 %v32_v28, %v31_v27  ;;  %v50_v36 = vld [vmem:[%s1627_s1 + $0xb8] sm:$0xff]  ;;  %v1245_v21 = vsub.s32 %v207_v2, %v209_v3 }
   0x9   :  { %v63_v31 = vld [vmem:[%s1627_s1 + $0x120] sm:$0xff]  ;;  %v64_v32 = vld [vmem:[%s1627_s1 + $0x128] sm:$0xff]  ;;  %881 = vmatpush3.bf16.msra.mxu0 %v880_v17  ;;  %v914_v34 = vpack.c.bf16 %v80_v30, %v79_v29  ;;  %v33_v37 = vld [vmem:[%s1627_s1 + $0x30] sm:$0xff]  ;;  %v886_v39 = vpack.c.bf16 %v50_v36, %v49_v35 }
   0xa   :  { %883 = vmatprep.subr.bf16.mxu0 %v882_v26  ;;  %v916_v38 = vpack.c.bf16 %v64_v32, %v63_v31  ;;  %v34_v40 = vld [vmem:[%s1627_s1 + $0x38] sm:$0xff]  ;;  %v81_v41 = vld [vmem:[%s1627_s1 + $0x1b0] sm:$0xff]  ;;  %v51_v46 = vld [vmem:[%s1627_s1 + $0xc0] sm:$0xff] }
   0xb   :  { %913 = vmatpush3.bf16.msra.mxu1 %v912_v25  ;;  %v82_v42 = vld [vmem:[%s1627_s1 + $0x1b8] sm:$0xff]  ;;  %v65_v44 = vld [vmem:[%s1627_s1 + $0x130] sm:$0xff]  ;;  %v52_v47 = vld [vmem:[%s1627_s1 + $0xc8] sm:$0xff]  ;;  %v888_v48 = vpack.c.bf16 %v34_v40, %v33_v37 }
   0xc   :  { %915 = vmatprep.subr.bf16.mxu1 %v914_v34  ;;  %v918_v43 = vpack.c.bf16 %v82_v42, %v81_v41  ;;  %v66_v45 = vld [vmem:[%s1627_s1 + $0x138] sm:$0xff]  ;;  %v83_v49 = vld [vmem:[%s1627_s1 + $0x1c0] sm:$0xff]  ;;  %v84_v50 = vld [vmem:[%s1627_s1 + $0x1c8] sm:$0xff]  ;;  %v890_v55 = vpack.c.bf16 %v52_v47, %v51_v46 }
   0xd   :  { %885 = vmatpush3.bf16.msra.mxu0 %v884_v33  ;;  %v920_v54 = vpack.c.bf16 %v66_v45, %v65_v44  ;;  %v35_v56 = vld [vmem:[%s1627_s1 + $0x40] sm:$0xff]  ;;  %v36_v57 = vld [vmem:[%s1627_s1 + $0x48] sm:$0xff]  ;;  %v922_v59 = vpack.c.bf16 %v84_v50, %v83_v49  ;;  %v53_v61 = vld [vmem:[%s1627_s1 + $0xd0] sm:$0xff] }
   0xe   :  { %887 = vmatprep.subr.bf16.mxu0 %v886_v39  ;;  %v67_v58 = vld [vmem:[%s1627_s1 + $0x140] sm:$0xff]  ;;  %v68_v60 = vld [vmem:[%s1627_s1 + $0x148] sm:$0xff]  ;;  %v54_v62 = vld [vmem:[%s1627_s1 + $0xd8] sm:$0xff]  ;;  %v892_v1 = vpack.c.bf16 %v36_v57, %v35_v56 }
   0xf   :  { %917 = vmatpush3.bf16.msra.mxu1 %v916_v38  ;;  %v85_v63 = vld [vmem:[%s1627_s1 + $0x1d0] sm:$0xff]  ;;  %v86_v0 = vld [vmem:[%s1627_s1 + $0x1d8] sm:$0xff]  ;;  %v924_v4 = vpack.c.bf16 %v68_v60, %v67_v58  ;;  %v894_v5 = vpack.c.bf16 %v54_v62, %v53_v61  ;;  %v55_v11 = vld [vmem:[%s1627_s1 + $0xe0] sm:$0xff] }
  0x10   :  { %919 = vmatprep.subr.bf16.mxu1 %v918_v43  ;;  %v37_v6 = vld [vmem:[%s1627_s1 + $0x50] sm:$0xff]  ;;  %v38_v7 = vld [vmem:[%s1627_s1 + $0x58] sm:$0xff]  ;;  %v926_v9 = vpack.c.bf16 %v86_v0, %v85_v63  ;;  %v56_v12 = vld [vmem:[%s1627_s1 + $0xe8] sm:$0xff] }
  0x11   :  { %889 = vmatpush3.bf16.msra.mxu0 %v888_v48  ;;  %v69_v8 = vld [vmem:[%s1627_s1 + $0x150] sm:$0xff]  ;;  %v70_v10 = vld [vmem:[%s1627_s1 + $0x158] sm:$0xff]  ;;  %v39_v13 = vld [vmem:[%s1627_s1 + $0x60] sm:$0xff]  ;;  %v896_v17 = vpack.c.bf16 %v38_v7, %v37_v6  ;;  %v898_v23 = vpack.c.bf16 %v56_v12, %v55_v11 }
  0x12   :  { %891 = vmatprep.subr.bf16.mxu0 %v890_v55  ;;  %v40_v14 = vld [vmem:[%s1627_s1 + $0x68] sm:$0xff]  ;;  %v87_v15 = vld [vmem:[%s1627_s1 + $0x1e0] sm:$0xff]  ;;  %v57_v20 = vld [vmem:[%s1627_s1 + $0xf0] sm:$0xff]  ;;  %v928_v22 = vpack.c.bf16 %v70_v10, %v69_v8 }
  0x13   :  { %921 = vmatpush3.bf16.msra.mxu1 %v920_v54  ;;  %v88_v16 = vld [vmem:[%s1627_s1 + $0x1e8] sm:$0xff]  ;;  %v71_v18 = vld [vmem:[%s1627_s1 + $0x160] sm:$0xff]  ;;  %v58_v25 = vld [vmem:[%s1627_s1 + $0xf8] sm:$0xff]  ;;  %v900_v30 = vpack.c.bf16 %v40_v14, %v39_v13 }
  0x14   :  { %923 = vmatprep.subr.bf16.mxu1 %v922_v59  ;;  %v72_v19 = vld [vmem:[%s1627_s1 + $0x168] sm:$0xff]  ;;  %v930_v24 = vpack.c.bf16 %v88_v16, %v87_v15  ;;  %v1035_v26 = vld [vmem:[%s1626_s0] ss:$20 sps:$4 sm:$0xff]   ;;  %v90_v29 = vld [vmem:[%s1627_s1 + $0x1f8] sm:$0xff]  ;;  %v902_v36 = vpack.c.bf16 %v58_v25, %v57_v20 }
  0x15   :  { %893 = vmatpush3.bf16.msra.mxu0 %v892_v1  ;;  %v1037_v27 = vld [vmem:[%s1626_s0 + $0x28] ss:$20 sps:$4 sm:$0xff]   ;;  %v89_v28 = vld [vmem:[%s1627_s1 + $0x1f0] sm:$0xff]  ;;  %v211_v31 = vrot.slane %v1035_v26, %v1245_v21  ;;  %v1039_v33 = vld [vmem:[%s1626_s0 + $0x4] ss:$20 sps:$4 sm:$0xff]   ;;  %v932_v35 = vpack.c.bf16 %v72_v19, %v71_v18 }
  0x16   :  { %895 = vmatprep.subr.bf16.mxu0 %v894_v5  ;;  %v225_v32 = vrot.slane %v1037_v27, %v1245_v21  ;;  %v1040_v34 = vld [vmem:[%s1626_s0 + $0x2c] ss:$20 sps:$4 sm:$0xff]   ;;  %v41_v37 = vld [vmem:[%s1627_s1 + $0x70] sm:$0xff]  ;;  %v42_v38 = vld [vmem:[%s1627_s1 + $0x78] sm:$0xff]  ;;  %v934_v40 = vpack.c.bf16 %v90_v29, %v89_v28  ;;  %v218_v45 = vrot.slane %v1039_v33, %v1245_v21 }
  0x17   :  { %925 = vmatpush3.bf16.msra.mxu1 %v924_v4  ;;  %v73_v39 = vld [vmem:[%s1627_s1 + $0x170] sm:$0xff]  ;;  %v74_v42 = vld [vmem:[%s1627_s1 + $0x178] sm:$0xff]  ;;  %v107_v43 = vld [vmem:[%s1627_s1 + $0x280] sm:$0xff]  ;;  %v232_v46 = vrot.slane %v1040_v34, %v1245_v21  ;;  %v904_v49 = vpack.c.bf16 %v42_v38, %v41_v37 }
  0x18   :  { %927 = vmatprep.subr.bf16.mxu1 %v926_v9  ;;  %v234_v41 = vcombine.high %v211_v31, %v225_v32  ;;  %v108_v44 = vld [vmem:[%s1627_s1 + $0x288] sm:$0xff]  ;;  %v139_v47 = vld [vmem:[%s1627_s1 + $0x380] sm:$0xff]  ;;  %v936_v51 = vpack.c.bf16 %v74_v42, %v73_v39  ;;  %v109_v58 = vld [vmem:[%s1627_s1 + $0x290] sm:$0xff]  ;;  %v233_v60 = vcombine.low %v211_v31, %v225_v32 }
  0x19   :  { %897 = vmatpush3.bf16.msra.mxu0 %v896_v17  ;;  %v140_v48 = vld [vmem:[%s1627_s1 + $0x388] sm:$0xff]  ;;  %v236_v50 = vcombine.high %v218_v45, %v232_v46  ;;  %v938_v52 = vpack.c.bf16 %v108_v44, %v107_v43  ;;  %v91_v53 = vld [vmem:[%s1627_s1 + $0x200] sm:$0xff]  ;;  %v110_v59 = vld [vmem:[%s1627_s1 + $0x298] sm:$0xff]  ;;  %v235_v0 = vcombine.low %v218_v45, %v232_v46 }
  0x1a   :  { %899 = vmatprep.subr.bf16.mxu0 %v898_v23  ;;  %365 = vmatprep.mubr.f32.mxu0 %v234_v41  ;;  %v92_v54 = vld [vmem:[%s1627_s1 + $0x208] sm:$0xff]  ;;  %v123_v55 = vld [vmem:[%s1627_s1 + $0x300] sm:$0xff]  ;;  %v970_v56 = vpack.c.bf16 %v140_v48, %v139_v47  ;;  %v141_v61 = vld [vmem:[%s1627_s1 + $0x390] sm:$0xff]  ;;  %v942_v2 = vpack.c.bf16 %v110_v59, %v109_v58 }
  0x1b   :  { %929 = vmatpush3.bf16.msra.mxu1 %v928_v22  ;;  %435 = vmatprep.mubr.f32.mxu1 %v236_v50  ;;  %v124_v57 = vld [vmem:[%s1627_s1 + $0x308] sm:$0xff]  ;;  %v142_v62 = vld [vmem:[%s1627_s1 + $0x398] sm:$0xff]  ;;  %v940_v63 = vpack.c.bf16 %v92_v54, %v91_v53  ;;  %v93_v3 = vld [vmem:[%s1627_s1 + $0x210] sm:$0xff] }
  0x1c   :  { %931 = vmatprep.subr.bf16.mxu1 %v930_v24  ;;  %v972_v1 = vpack.c.bf16 %v124_v57, %v123_v55  ;;  %v94_v4 = vld [vmem:[%s1627_s1 + $0x218] sm:$0xff]  ;;  %v125_v5 = vld [vmem:[%s1627_s1 + $0x310] sm:$0xff]  ;;  %v974_v6 = vpack.c.bf16 %v142_v62, %v141_v61  ;;  %v111_v8 = vld [vmem:[%s1627_s1 + $0x2a0] sm:$0xff] }
  0x1d   :  { %901 = vmatpush3.bf16.msra.mxu0 %v900_v30  ;;  %v126_v7 = vld [vmem:[%s1627_s1 + $0x318] sm:$0xff]  ;;  %v112_v9 = vld [vmem:[%s1627_s1 + $0x2a8] sm:$0xff]  ;;  %v143_v10 = vld [vmem:[%s1627_s1 + $0x3a0] sm:$0xff]  ;;  %v944_v12 = vpack.c.bf16 %v94_v4, %v93_v3 }
  0x1e   :  { %903 = vmatprep.subr.bf16.mxu0 %v902_v36  ;;  %v144_v11 = vld [vmem:[%s1627_s1 + $0x3a8] sm:$0xff]  ;;  %v976_v13 = vpack.c.bf16 %v126_v7, %v125_v5  ;;  %v946_v14 = vpack.c.bf16 %v112_v9, %v111_v8  ;;  %v95_v15 = vld [vmem:[%s1627_s1 + $0x220] sm:$0xff]  ;;  %v113_v20 = vld [vmem:[%s1627_s1 + $0x2b0] sm:$0xff] }
  0x1f   :  { %933 = vmatpush3.bf16.msra.mxu1 %v932_v35  ;;  %v96_v16 = vld [vmem:[%s1627_s1 + $0x228] sm:$0xff]  ;;  %v127_v17 = vld [vmem:[%s1627_s1 + $0x320] sm:$0xff]  ;;  %v978_v18 = vpack.c.bf16 %v144_v11, %v143_v10  ;;  %v114_v22 = vld [vmem:[%s1627_s1 + $0x2b8] sm:$0xff] }
  0x20   :  { %935 = vmatprep.subr.bf16.mxu1 %v934_v40  ;;  %v128_v19 = vld [vmem:[%s1627_s1 + $0x328] sm:$0xff]  ;;  %v145_v23 = vld [vmem:[%s1627_s1 + $0x3b0] sm:$0xff]  ;;  %v146_v24 = vld [vmem:[%s1627_s1 + $0x3b8] sm:$0xff]  ;;  %v948_v25 = vpack.c.bf16 %v96_v16, %v95_v15  ;;  %v950_v27 = vpack.c.bf16 %v114_v22, %v113_v20 }
  0x21   :  { %905 = vmatpush3.bf16.msra.mxu0 %v904_v49  ;;  %v980_v26 = vpack.c.bf16 %v128_v19, %v127_v17  ;;  %v97_v28 = vld [vmem:[%s1627_s1 + $0x230] sm:$0xff]  ;;  %v98_v29 = vld [vmem:[%s1627_s1 + $0x238] sm:$0xff]  ;;  %v982_v31 = vpack.c.bf16 %v146_v24, %v145_v23  ;;  %v115_v33 = vld [vmem:[%s1627_s1 + $0x2c0] sm:$0xff] }
  0x22   :  { %939 = vmatprep.subr.bf16.mxu0 %v938_v52  ;;  %v129_v30 = vld [vmem:[%s1627_s1 + $0x330] sm:$0xff]  ;;  %v130_v32 = vld [vmem:[%s1627_s1 + $0x338] sm:$0xff]  ;;  %v116_v34 = vld [vmem:[%s1627_s1 + $0x2c8] sm:$0xff]  ;;  %v952_v39 = vpack.c.bf16 %v98_v29, %v97_v28 }
  0x23   :  { %937 = vmatpush3.bf16.msra.mxu1 %v936_v51  ;;  %v99_v35 = vld [vmem:[%s1627_s1 + $0x240] sm:$0xff]  ;;  %v100_v36 = vld [vmem:[%s1627_s1 + $0x248] sm:$0xff]  ;;  %v117_v42 = vld [vmem:[%s1627_s1 + $0x2d0] sm:$0xff]  ;;  %v984_v43 = vpack.c.bf16 %v130_v32, %v129_v30  ;;  %v954_v44 = vpack.c.bf16 %v116_v34, %v115_v33 }
  0x24   :  { %971 = vmatprep.subr.bf16.mxu1 %v970_v56  ;;  %366 = vmatmul.mubr.f32.vlgmr.msra.gmra.mrb[0].mxu0 %v233_v60  ;;  %v147_v37 = vld [vmem:[%s1627_s1 + $0x3c0] sm:$0xff]  ;;  %v148_v38 = vld [vmem:[%s1627_s1 + $0x3c8] sm:$0xff]  ;;  %v118_v46 = vld [vmem:[%s1627_s1 + $0x2d8] sm:$0xff]  ;;  %v956_v51 = vpack.c.bf16 %v100_v36, %v99_v35 }
  0x25   :  { %941 = vmatpush3.bf16.msra.mxu0 %v940_v63  ;;  %v131_v40 = vld [vmem:[%s1627_s1 + $0x340] sm:$0xff]  ;;  %v132_v41 = vld [vmem:[%s1627_s1 + $0x348] sm:$0xff]  ;;  %v986_v45 = vpack.c.bf16 %v148_v38, %v147_v37  ;;  %v149_v49 = vld [vmem:[%s1627_s1 + $0x3d0] sm:$0xff]  ;;  %v958_v57 = vpack.c.bf16 %v118_v46, %v117_v42 }
  0x26   :  { %436 = vmatmul.mubr.f32.vlgmr.msra.gmra.mrb[0].mxu1 %v235_v0  ;;  %943 = vmatprep.subr.bf16.mxu0 %v942_v2  ;;  %v1041_v47 = vld [vmem:[%s1626_s0 + $0x8] ss:$20 sps:$4 sm:$0xff]   ;;  %v1043_v48 = vld [vmem:[%s1626_s0 + $0x30] ss:$20 sps:$4 sm:$0xff]   ;;  %v1045_v54 = vld [vmem:[%s1626_s0 + $0xc] ss:$20 sps:$4 sm:$0xff]   ;;  %v988_v56 = vpack.c.bf16 %v132_v41, %v131_v40 }
  0x27   :  { %973 = vmatpush3.bf16.msra.mxu1 %v972_v1  ;;  %v150_v50 = vld [vmem:[%s1627_s1 + $0x3d8] sm:$0xff]  ;;  %v1423_v52 = vrot.slane %v1041_v47, %v1245_v21  ;;  %v1426_v53 = vrot.slane %v1043_v48, %v1245_v21  ;;  %v1046_v55 = vld [vmem:[%s1626_s0 + $0x34] ss:$20 sps:$4 sm:$0xff]   ;;  %v119_v63 = vld [vmem:[%s1627_s1 + $0x2e0] sm:$0xff]  ;;  %v1455_v2 = vrot.slane %v1045_v54, %v1245_v21 }
  0x28   :  { %975 = vmatprep.subr.bf16.mxu1 %v974_v6  ;;  %v101_v58 = vld [vmem:[%s1627_s1 + $0x250] sm:$0xff]  ;;  %v102_v59 = vld [vmem:[%s1627_s1 + $0x258] sm:$0xff]  ;;  %v990_v61 = vpack.c.bf16 %v150_v50, %v149_v49  ;;  %v120_v0 = vld [vmem:[%s1627_s1 + $0x2e8] sm:$0xff]  ;;  %v1458_v3 = vrot.slane %v1046_v55, %v1245_v21 }
  0x29   :  { %945 = vmatpush3.bf16.msra.mxu0 %v944_v12  ;;  %v133_v60 = vld [vmem:[%s1627_s1 + $0x350] sm:$0xff]  ;;  %v134_v62 = vld [vmem:[%s1627_s1 + $0x358] sm:$0xff]  ;;  %v270_v1 = vcombine.high %v1423_v52, %v1426_v53  ;;  %v151_v4 = vld [vmem:[%s1627_s1 + $0x3e0] sm:$0xff]  ;;  %v960_v6 = vpack.c.bf16 %v102_v59, %v101_v58  ;;  %v962_v9 = vpack.c.bf16 %v120_v0, %v119_v63  ;;  %v269_v41 = vcombine.low %v1423_v52, %v1426_v53 }
  0x2a   :  { %947 = vmatprep.subr.bf16.mxu0 %v946_v14  ;;  %v152_v5 = vld [vmem:[%s1627_s1 + $0x3e8] sm:$0xff]  ;;  %v272_v7 = vcombine.high %v1455_v2, %v1458_v3  ;;  %v992_v8 = vpack.c.bf16 %v134_v62, %v133_v60  ;;  %v103_v10 = vld [vmem:[%s1627_s1 + $0x260] sm:$0xff]  ;;  %v121_v15 = vld [vmem:[%s1627_s1 + $0x2f0] sm:$0xff] }
  0x2b   :  { %977 = vmatpush3.bf16.msra.mxu1 %v976_v13  ;;  %505 = vmatprep.mubr.f32.mxu0 %v270_v1  ;;  %v104_v11 = vld [vmem:[%s1627_s1 + $0x268] sm:$0xff]  ;;  %v135_v12 = vld [vmem:[%s1627_s1 + $0x360] sm:$0xff]  ;;  %v994_v13 = vpack.c.bf16 %v152_v5, %v151_v4  ;;  %v122_v16 = vld [vmem:[%s1627_s1 + $0x2f8] sm:$0xff] }
  0x2c   :  { %979 = vmatprep.subr.bf16.mxu1 %v978_v18  ;;  %v136_v14 = vld [vmem:[%s1627_s1 + $0x368] sm:$0xff]  ;;  %575 = vmatprep.mubr.f32.mxu1 %v272_v7  ;;  %v153_v17 = vld [vmem:[%s1627_s1 + $0x3f0] sm:$0xff]  ;;  %v154_v18 = vld [vmem:[%s1627_s1 + $0x3f8] sm:$0xff]  ;;  %v964_v19 = vpack.c.bf16 %v104_v11, %v103_v10  ;;  %v966_v23 = vpack.c.bf16 %v122_v16, %v121_v15 }
  0x2d   :  { %949 = vmatpush3.bf16.msra.mxu0 %v948_v25  ;;  %v105_v20 = vld [vmem:[%s1627_s1 + $0x270] sm:$0xff]  ;;  %v996_v22 = vpack.c.bf16 %v136_v14, %v135_v12  ;;  %v106_v24 = vld [vmem:[%s1627_s1 + $0x278] sm:$0xff]  ;;  %v171_v28 = vld [vmem:[%s1627_s1 + $0x480] sm:$0xff] }
  0x2e   :  { %951 = vmatprep.subr.bf16.mxu0 %v950_v27  ;;  %v137_v25 = vld [vmem:[%s1627_s1 + $0x370] sm:$0xff]  ;;  %v998_v27 = vpack.c.bf16 %v154_v18, %v153_v17  ;;  %v172_v29 = vld [vmem:[%s1627_s1 + $0x488] sm:$0xff]  ;;  %v968_v30 = vpack.c.bf16 %v106_v24, %v105_v20  ;;  %v155_v35 = vld [vmem:[%s1627_s1 + $0x400] sm:$0xff] }
  0x2f   :  { %981 = vmatpush3.bf16.msra.mxu1 %v980_v26  ;;  %v138_v26 = vld [vmem:[%s1627_s1 + $0x378] sm:$0xff]  ;;  %v1002_v34 = vpack.c.bf16 %v172_v29, %v171_v28  ;;  %v156_v36 = vld [vmem:[%s1627_s1 + $0x408] sm:$0xff]  ;;  %v173_v37 = vld [vmem:[%s1627_s1 + $0x490] sm:$0xff] }
  0x30   :  { %983 = vmatprep.subr.bf16.mxu1 %v982_v31  ;;  %v1047_v31 = vld [vmem:[%s1626_s0 + $0x10] ss:$20 sps:$4 sm:$0xff]   ;;  %v1048_v32 = vld [vmem:[%s1626_s0 + $0x38] ss:$20 sps:$4 sm:$0xff]   ;;  %v1000_v33 = vpack.c.bf16 %v138_v26, %v137_v25  ;;  %v1004_v42 = vpack.c.bf16 %v156_v36, %v155_v35 }
  0x31   :  { %953 = vmatpush3.bf16.msra.mxu0 %v952_v39  ;;  %v174_v38 = vld [vmem:[%s1627_s1 + $0x498] sm:$0xff]  ;;  %v1529_v39 = vrot.slane %v1047_v31, %v1245_v21  ;;  %v1532_v40 = vrot.slane %v1048_v32, %v1245_v21  ;;  %v175_v47 = vld [vmem:[%s1627_s1 + $0x4a0] sm:$0xff]  ;;  %v176_v48 = vld [vmem:[%s1627_s1 + $0x4a8] sm:$0xff] }
  0x32   :  { %955 = vmatprep.subr.bf16.mxu0 %v954_v44  ;;  %v1006_v44 = vpack.c.bf16 %v174_v38, %v173_v37  ;;  %v158_v21 = vld [vmem:[%s1627_s1 + $0x418] sm:$0xff]  ;;  %v1010_v50 = vpack.c.bf16 %v176_v48, %v175_v47  ;;  %v160_v52 = vld [vmem:[%s1627_s1 + $0x428] sm:$0xff]  ;;  %v177_v53 = vld [vmem:[%s1627_s1 + $0x4b0] sm:$0xff] }
  0x33   :  { %985 = vmatpush3.bf16.msra.mxu1 %v984_v43  ;;  %v271_v43 = vcombine.low %v1455_v2, %v1458_v3  ;;  %v290_v46 = vcombine.high %v1529_v39, %v1532_v40  ;;  %v178_v54 = vld [vmem:[%s1627_s1 + $0x4b8] sm:$0xff]  ;;  %v179_v59 = vld [vmem:[%s1627_s1 + $0x4c0] sm:$0xff]  ;;  %v180_v60 = vld [vmem:[%s1627_s1 + $0x4c8] sm:$0xff]  ;;  %v289_v20 = vcombine.low %v1529_v39, %v1532_v40 }
  0x34   :  { %987 = vmatprep.subr.bf16.mxu1 %v986_v45  ;;  %v157_v45 = vld [vmem:[%s1627_s1 + $0x410] sm:$0xff]  ;;  %v162_v58 = vld [vmem:[%s1627_s1 + $0x438] sm:$0xff]  ;;  %v1018_v62 = vpack.c.bf16 %v180_v60, %v179_v59  ;;  %v163_v63 = vld [vmem:[%s1627_s1 + $0x440] sm:$0xff] }
  0x35   :  { %957 = vmatpush3.bf16.msra.mxu0 %v956_v51  ;;  %v1008_v49 = vpack.c.bf16 %v158_v21, %v157_v45  ;;  %v159_v51 = vld [vmem:[%s1627_s1 + $0x420] sm:$0xff]  ;;  %v164_v0 = vld [vmem:[%s1627_s1 + $0x448] sm:$0xff]  ;;  %v181_v1 = vld [vmem:[%s1627_s1 + $0x4d0] sm:$0xff] }
  0x36   :  { %959 = vmatprep.subr.bf16.mxu0 %v958_v57  ;;  %v1012_v55 = vpack.c.bf16 %v160_v52, %v159_v51  ;;  %v161_v57 = vld [vmem:[%s1627_s1 + $0x430] sm:$0xff]  ;;  %v182_v2 = vld [vmem:[%s1627_s1 + $0x4d8] sm:$0xff]  ;;  %v1020_v3 = vpack.c.bf16 %v164_v0, %v163_v63  ;;  %v183_v7 = vld [vmem:[%s1627_s1 + $0x4e0] sm:$0xff] }
  0x37   :  { %989 = vmatpush3.bf16.msra.mxu1 %v988_v56  ;;  %v1014_v56 = vpack.c.bf16 %v178_v54, %v177_v53  ;;  %v1022_v4 = vpack.c.bf16 %v182_v2, %v181_v1  ;;  %v165_v5 = vld [vmem:[%s1627_s1 + $0x450] sm:$0xff]  ;;  %v167_v11 = vld [vmem:[%s1627_s1 + $0x460] sm:$0xff]  ;;  %v168_v12 = vld [vmem:[%s1627_s1 + $0x468] sm:$0xff] }
  0x38   :  { %991 = vmatprep.subr.bf16.mxu1 %v990_v61  ;;  %v1016_v61 = vpack.c.bf16 %v162_v58, %v161_v57  ;;  %v186_v14 = vld [vmem:[%s1627_s1 + $0x4f8] sm:$0xff]  ;;  %v1028_v15 = vpack.c.bf16 %v168_v12, %v167_v11  ;;  %v169_v17 = vld [vmem:[%s1627_s1 + $0x470] sm:$0xff] }
  0x39   :  { %961 = vmatpush3.bf16.msra.mxu0 %v960_v6  ;;  %v166_v6 = vld [vmem:[%s1627_s1 + $0x458] sm:$0xff] }
  0x3a   :  { %963 = vmatprep.subr.bf16.mxu0 %v962_v9  ;;  %v1024_v9 = vpack.c.bf16 %v166_v6, %v165_v5  ;;  %v170_v18 = vld [vmem:[%s1627_s1 + $0x478] sm:$0xff] }
  0x3b   :  { %993 = vmatpush3.bf16.msra.mxu1 %v992_v8  ;;  %v184_v8 = vld [vmem:[%s1627_s1 + $0x4e8] sm:$0xff] }
  0x3c   :  { %995 = vmatprep.subr.bf16.mxu1 %v994_v13  ;;  %v1026_v10 = vpack.c.bf16 %v184_v8, %v183_v7  ;;  %v185_v13 = vld [vmem:[%s1627_s1 + $0x4f0] sm:$0xff] }
  0x3d   :  { %965 = vmatpush3.bf16.msra.mxu0 %v964_v19  ;;  %v1030_v16 = vpack.c.bf16 %v186_v14, %v185_v13  ;;  %v1032_v19 = vpack.c.bf16 %v170_v18, %v169_v17 }
  0x3e   :  { %967 = vmatprep.subr.bf16.mxu0 %v966_v23  ;;  %v188_v23 = vstv %s1628_s2 }
  0x3f   :  { %997 = vmatpush3.bf16.msra.mxu1 %v996_v22 }
  0x40   :  { %999 = vmatprep.subr.bf16.mxu1 %v998_v27 }
  0x41   :  { %969 = vmatpush3.bf16.msra.mxu0 %v968_v30 }
  0x42   :  { %1003 = vmatprep.subr.bf16.mxu0 %v1002_v34 }
  0x43   :  { %1001 = vmatpush3.bf16.msra.mxu1 %v1000_v33 }
  0x44   :  { %506 = vmatmul.mubr.f32.vlgmr.msra.gmra.mrb[2].mxu0 %v269_v41 }
  0x45   :  { %1005 = vmatpush3.bf16.msra.mxu0 %v1004_v42  ;;  %645 = vmatprep.mubr.f32.mxu0 %v290_v46 }
  0x46   :  { %576 = vmatmul.mubr.f32.vlgmr.msra.gmra.mrb[2].mxu1 %v271_v43  ;;  %1007 = vmatprep.subr.bf16.mxu0 %v1006_v44 }
  0x49   :  { %1009 = vmatpush3.bf16.msra.mxu0 %v1008_v49 }
  0x4a   :  { %1011 = vmatprep.subr.bf16.mxu0 %v1010_v50 }
  0x4d   :  { %1013 = vmatpush3.bf16.msra.mxu0 %v1012_v55 }
  0x4e   :  { %1015 = vmatprep.subr.bf16.mxu0 %v1014_v56 }
  0x51   :  { %1017 = vmatpush3.bf16.msra.mxu0 %v1016_v61 }
  0x52   :  { %1019 = vmatprep.subr.bf16.mxu0 %v1018_v62 }
  0x55   :  { %1021 = vmatpush3.bf16.msra.mxu0 %v1020_v3 }
  0x56   :  { %1023 = vmatprep.subr.bf16.mxu0 %v1022_v4 }
  0x59   :  { %1025 = vmatpush3.bf16.msra.mxu0 %v1024_v9 }
  0x5a   :  { %1027 = vmatprep.subr.bf16.mxu0 %v1026_v10 }
  0x5d   :  { %1029 = vmatpush3.bf16.msra.mxu0 %v1028_v15 }
  0x5e   :  { %1031 = vmatprep.subr.bf16.mxu0 %v1030_v16 }
  0x61   :  { %1033 = vmatpush3.bf16.msra.mxu0 %v1032_v19 }
  0x64   :  { %646 = vmatmul.mubr.f32.vlgmr.msra.gmra.mrb[4].mxu0 %v289_v20 }
  0xf7   :  { %v731_v22 = vpop.f32.mrb[0].mxu0 }
  0xf8   :  { %v732_v24 = vpop.f32.mrb[1].mxu0 }
  0xf9   :  { %v766_v25 = vpop.f32.mrb[0].mxu1  ;;  %v733_v26 = vadd.f32 %v732_v24, %v731_v22 }
  0xfa   :  { %v767_v27 = vpop.f32.mrb[1].mxu1 }
  0xfb   :  { %v768_v28 = vadd.f32 %v767_v27, %v766_v25  ;;  %v368_v29 = vadd.f32 %v733_v26, %v188_v23 }
  0xfd   :  { %v438_v30 = vadd.f32 %v768_v28, %v368_v29 }
 0x117   :  { %v801_v31 = vpop.f32.mrb[2].mxu0 }
 0x118   :  { %v802_v32 = vpop.f32.mrb[3].mxu0 }
 0x119   :  { %v836_v33 = vpop.f32.mrb[2].mxu1  ;;  %v803_v34 = vadd.f32 %v802_v32, %v801_v31 }
 0x11a   :  { %v837_v35 = vpop.f32.mrb[3].mxu1 }
 0x11b   :  { %v838_v36 = vadd.f32 %v837_v35, %v836_v33  ;;  %v508_v37 = vadd.f32 %v803_v34, %v438_v30 }
 0x11d   :  { %v578_v38 = vadd.f32 %v838_v36, %v508_v37 }
 0x137   :  { %v871_v39 = vpop.f32.mrb[4].mxu0 }
 0x138   :  { %v872_v40 = vpop.f32.mrb[5].mxu0 }
 0x139   :  { %v873_v41 = vadd.f32 %v872_v40, %v871_v39 }
 0x13b   :  { %v648_v42 = vadd.f32 %v873_v41, %v578_v38 }
 0x13d   :  { %v698_v43 = vmul.f32 -1.442695, %v648_v42 }
 0x13f   :  { %1049 = vpow2.f32 %v698_v43 }
 0x149   :  { %v1050_v44 = vpop.eup %1049 }
 0x14a   :  { %v654_v45 = vadd.f32 1.0, %v1050_v44 }
 0x14c   :  { %1051 = vrcp.f32 %v654_v45 }
 0x156   :  { %v1052_v21 = vpop.eup %1051 }
 0x157   :  { %658 = vst.msk [vmem:[#allocation3] sm:$0xff] %vm657_vm0, %v1052_v21 }
 0x15e   :  { %v676_v46 = vld [vmem:[#allocation3] sm:$0x3] }
 0x15f   :  { %677 = vst [vmem:[%s1629_s3] sm:$0x3] %v676_v46 }

</bundles_post_ra>
